<compile_context>
chip_gen: v7x
topology: tpu7x:2x2x1
jax: 0.10.0
libtpu: 0.0.40
codegen_flags: <defaults>
</compile_context>

<pallas_src>
import functools

import jax
import jax.numpy as jnp
from jax.experimental import pallas as pl
from jax.experimental.pallas import tpu as pltpu


def _round_up(n, m):
    return ((n + m - 1) // m) * m


def autoencoder_kernel(x_ref,
                       w1_ref, b1_ref,
                       w2_ref, b2_ref,
                       w3_ref, b3_ref,
                       w4_ref, b4_ref,
                       pred_ref, emb_ref):
    # Feature-major: x is [inp, TB]; each layer is W[out,in] @ x + b[out,1].
    x = x_ref[...]                                                        # [inp, TB]

    # encoder: Linear(inp,16) + ReLU
    h1 = jnp.dot(w1_ref[...], x, preferred_element_type=jnp.float32) + b1_ref[...]
    h1 = jnp.maximum(h1, 0.0)                                             # [16, TB]
    # encoder: Linear(16,8) + ReLU -> embeddings
    emb = jnp.dot(w2_ref[...], h1, preferred_element_type=jnp.float32) + b2_ref[...]
    emb = jnp.maximum(emb, 0.0)                                           # [8, TB]

    # decoder: Linear(8,16) + ReLU
    h2 = jnp.dot(w3_ref[...], emb, preferred_element_type=jnp.float32) + b3_ref[...]
    h2 = jnp.maximum(h2, 0.0)                                             # [16, TB]
    # decoder: Linear(16,inp) + Sigmoid -> prediction
    logits = jnp.dot(w4_ref[...], h2, preferred_element_type=jnp.float32) + b4_ref[...]
    pred = jax.nn.sigmoid(logits)                                         # [inp, TB]

    pred_ref[...] = pred.astype(pred_ref.dtype)
    emb_ref[...] = emb.astype(emb_ref.dtype)


@functools.partial(jax.jit, static_argnames=("tb",))
def autoencoder_forward(x, params, *, tb=512):
    """x: [B, inp] float32.  params: PyTorch-layout weights [out,in], biases [out,1].

    Returns (prediction [B, inp], embeddings [B, 8]) — same semantics as the
    PyTorch AutoEncoder.forward.
    """
    B, inp = x.shape
    w1, b1 = params["w1"], params["b1"]   # [16, inp], [16, 1]
    w2, b2 = params["w2"], params["b2"]   # [8, 16],   [8, 1]
    w3, b3 = params["w3"], params["b3"]   # [16, 8],   [16, 1]
    w4, b4 = params["w4"], params["b4"]   # [inp, 16], [inp, 1]

    # Batch tile: multiple of 128 for lane-dense stores; capped so tiny batches
    # aren't massively over-padded. Pad batch up to a whole number of tiles.
    tb_eff = min(tb, _round_up(B, 128))
    bp = _round_up(B, tb_eff)
    grid = (bp // tb_eff,)

    # Layout plumbing: batch-major -> feature-major, zero-pad the batch axis.
    x_fm = jnp.pad(x.T, ((0, 0), (0, bp - B)))            # [inp, Bp]

    const = lambda shape: pl.BlockSpec(shape, lambda i: (0, 0))

    pred_fm, emb_fm = pl.pallas_call(
        autoencoder_kernel,
        out_shape=(
            jax.ShapeDtypeStruct((inp, bp), x.dtype),
            jax.ShapeDtypeStruct((8, bp), x.dtype),
        ),
        grid=grid,
        in_specs=[
            pl.BlockSpec((inp, tb_eff), lambda i: (0, i)),   # batch-tiled input
            const(w1.shape), const(b1.shape),                # VMEM-resident params
            const(w2.shape), const(b2.shape),
            const(w3.shape), const(b3.shape),
            const(w4.shape), const(b4.shape),
        ],
        out_specs=(
            pl.BlockSpec((inp, tb_eff), lambda i: (0, i)),   # lane-dense pred tile
            pl.BlockSpec((8, tb_eff), lambda i: (0, i)),     # lane-dense emb tile
        ),
        compiler_params=pltpu.CompilerParams(
            dimension_semantics=("parallel",)),              # 2x on v7x megacore
    )(x_fm, w1, b1, w2, b2, w3, b3, w4, b4)

    # Back to PyTorch-style batch-major outputs.
    pred = pred_fm[:, :B].T
    emb = emb_fm[:, :B].T
    return pred, emb


def init_params(key, inp):
    """Deterministic parameter init (uniform, roughly like PyTorch's default).

    Weights are kept in the PyTorch-native [out_features, in_features] layout;
    biases are stored as [out_features, 1] columns (feature-major broadcast).
    """
    def linear(key, fan_in, fan_out):
        kw, kb = jax.random.split(key)
        bound = 1.0 / jnp.sqrt(jnp.float32(fan_in))
        w = jax.random.uniform(kw, (fan_out, fan_in), jnp.float32, -bound, bound)
        b = jax.random.uniform(kb, (fan_out, 1), jnp.float32, -bound, bound)
        return w, b

    k1, k2, k3, k4 = jax.random.split(key, 4)
    w1, b1 = linear(k1, inp, 16)
    w2, b2 = linear(k2, 16, 8)
    w3, b3 = linear(k3, 8, 16)
    w4, b4 = linear(k4, 16, inp)
    return {"w1": w1, "b1": b1, "w2": w2, "b2": b2,
            "w3": w3, "b3": b3, "w4": w4, "b4": b4}


def reference_forward(x, p):
    """Pure-JAX reference with PyTorch nn.Linear semantics (y = x @ W.T + b)."""
    h = jnp.maximum(x @ p["w1"].T + p["b1"].T, 0.0)
    emb = jnp.maximum(h @ p["w2"].T + p["b2"].T, 0.0)
    h = jnp.maximum(emb @ p["w3"].T + p["b3"].T, 0.0)
    pred = jax.nn.sigmoid(h @ p["w4"].T + p["b4"].T)
    return pred, emb


if __name__ == "__main__":
    key = jax.random.PRNGKey(0)
    kx, kp, kx2 = jax.random.split(key, 3)

    INP = 32
    params = init_params(kp, INP)

    # Small primary test (single tile, padded batch).
    B = 8
    x = jax.random.uniform(kx, (B, INP), jnp.float32)
    pred, emb = autoencoder_forward(x, params)
    jax.block_until_ready((pred, emb))
    pred_ref, emb_ref = reference_forward(x, params)
    assert pred.shape == (B, INP) and emb.shape == (B, 8)
    assert jnp.allclose(pred, pred_ref, atol=1e-5, rtol=1e-5)
    assert jnp.allclose(emb, emb_ref, atol=1e-5, rtol=1e-5)

    # Second test: batch that needs multiple grid steps + a ragged (padded) tail,
    # exercising the pipelined/parallel batch-tiled path.
    B2 = 300
    x2 = jax.random.uniform(kx2, (B2, INP), jnp.float32)
    pred2, emb2 = autoencoder_forward(x2, params, tb=128)
    jax.block_until_ready((pred2, emb2))
    pred2_ref, emb2_ref = reference_forward(x2, params)
    assert pred2.shape == (B2, INP) and emb2.shape == (B2, 8)
    assert jnp.allclose(pred2, pred2_ref, atol=1e-5, rtol=1e-5)
    assert jnp.allclose(emb2, emb2_ref, atol=1e-5, rtol=1e-5)

    print("KERNEL_OK")
</pallas_src>

<mosaic_0001>
module attributes {stable_mosaic.version = 11 : i64} {
  func.func @autoencoder_kernel(%arg0: i32, %arg1: memref<32x128xf32, #tpu.memory_space<vmem>>, %arg2: memref<16x32xf32, #tpu.memory_space<vmem>>, %arg3: memref<16x1xf32, #tpu.memory_space<vmem>>, %arg4: memref<8x16xf32, #tpu.memory_space<vmem>>, %arg5: memref<8x1xf32, #tpu.memory_space<vmem>>, %arg6: memref<16x8xf32, #tpu.memory_space<vmem>>, %arg7: memref<16x1xf32, #tpu.memory_space<vmem>>, %arg8: memref<32x16xf32, #tpu.memory_space<vmem>>, %arg9: memref<32x1xf32, #tpu.memory_space<vmem>>, %arg10: memref<32x128xf32, #tpu.memory_space<vmem>>, %arg11: memref<8x128xf32, #tpu.memory_space<vmem>>) attributes {dimension_semantics = [#tpu.dimension_semantics<parallel>], iteration_bounds = array<i64: 1>, scalar_prefetch = 0 : i64, scratch_operands = 0 : i64, tpu.core_type = #tpu.core_type<tc>, window_params = [{transform_indices = @transform_0, window_bounds = array<i64: 32, 128>}, {pipeline_mode = #tpu.pipeline_mode<synchronous>, transform_indices = @transform_1, window_bounds = array<i64: 16, 32>}, {pipeline_mode = #tpu.pipeline_mode<synchronous>, transform_indices = @transform_2, window_bounds = array<i64: 16, 1>}, {pipeline_mode = #tpu.pipeline_mode<synchronous>, transform_indices = @transform_3, window_bounds = array<i64: 8, 16>}, {pipeline_mode = #tpu.pipeline_mode<synchronous>, transform_indices = @transform_4, window_bounds = array<i64: 8, 1>}, {pipeline_mode = #tpu.pipeline_mode<synchronous>, transform_indices = @transform_5, window_bounds = array<i64: 16, 8>}, {pipeline_mode = #tpu.pipeline_mode<synchronous>, transform_indices = @transform_6, window_bounds = array<i64: 16, 1>}, {pipeline_mode = #tpu.pipeline_mode<synchronous>, transform_indices = @transform_7, window_bounds = array<i64: 32, 16>}, {pipeline_mode = #tpu.pipeline_mode<synchronous>, transform_indices = @transform_8, window_bounds = array<i64: 32, 1>}, {transform_indices = @transform_9, window_bounds = array<i64: 32, 128>}, {transform_indices = @transform_10, window_bounds = array<i64: 8, 128>}]} {
    %c0 = arith.constant 0 : index
    %c0_0 = arith.constant 0 : index
    %0 = vector.load %arg1[%c0, %c0_0] : memref<32x128xf32, #tpu.memory_space<vmem>>, vector<32x128xf32>
    %c0_1 = arith.constant 0 : index
    %c0_2 = arith.constant 0 : index
    %1 = vector.load %arg2[%c0_1, %c0_2] : memref<16x32xf32, #tpu.memory_space<vmem>>, vector<16x32xf32>
    %cst = arith.constant dense<0.000000e+00> : vector<16x128xf32>
    %2 = tpu.matmul %1, %0, %cst {dimension_numbers = #tpu.dot_dimension_numbers<[1], [0], [0], [1], [0, 0, 1, 1], [], []>} : vector<16x32xf32>, vector<32x128xf32>, vector<16x128xf32> -> vector<16x128xf32>
    %c0_3 = arith.constant 0 : index
    %c0_4 = arith.constant 0 : index
    %3 = vector.load %arg3[%c0_3, %c0_4] : memref<16x1xf32, #tpu.memory_space<vmem>>, vector<16x1xf32>
    %4 = vector.broadcast %3 : vector<16x1xf32> to vector<16x128xf32>
    %5 = arith.addf %2, %4 : vector<16x128xf32>
    %cst_5 = arith.constant 0.000000e+00 : f32
    %6 = vector.broadcast %cst_5 : f32 to vector<16x128xf32>
    %7 = arith.maximumf %5, %6 : vector<16x128xf32>
    %c0_6 = arith.constant 0 : index
    %c0_7 = arith.constant 0 : index
    %8 = vector.load %arg4[%c0_6, %c0_7] : memref<8x16xf32, #tpu.memory_space<vmem>>, vector<8x16xf32>
    %cst_8 = arith.constant dense<0.000000e+00> : vector<8x128xf32>
    %9 = tpu.matmul %8, %7, %cst_8 {dimension_numbers = #tpu.dot_dimension_numbers<[1], [0], [0], [1], [0, 0, 1, 1], [], []>} : vector<8x16xf32>, vector<16x128xf32>, vector<8x128xf32> -> vector<8x128xf32>
    %c0_9 = arith.constant 0 : index
    %c0_10 = arith.constant 0 : index
    %10 = vector.load %arg5[%c0_9, %c0_10] : memref<8x1xf32, #tpu.memory_space<vmem>>, vector<8x1xf32>
    %11 = vector.broadcast %10 : vector<8x1xf32> to vector<8x128xf32>
    %12 = arith.addf %9, %11 : vector<8x128xf32>
    %cst_11 = arith.constant 0.000000e+00 : f32
    %13 = vector.broadcast %cst_11 : f32 to vector<8x128xf32>
    %14 = arith.maximumf %12, %13 : vector<8x128xf32>
    %c0_12 = arith.constant 0 : index
    %c0_13 = arith.constant 0 : index
    %15 = vector.load %arg6[%c0_12, %c0_13] : memref<16x8xf32, #tpu.memory_space<vmem>>, vector<16x8xf32>
    %cst_14 = arith.constant dense<0.000000e+00> : vector<16x128xf32>
    %16 = tpu.matmul %15, %14, %cst_14 {dimension_numbers = #tpu.dot_dimension_numbers<[1], [0], [0], [1], [0, 0, 1, 1], [], []>} : vector<16x8xf32>, vector<8x128xf32>, vector<16x128xf32> -> vector<16x128xf32>
    %c0_15 = arith.constant 0 : index
    %c0_16 = arith.constant 0 : index
    %17 = vector.load %arg7[%c0_15, %c0_16] : memref<16x1xf32, #tpu.memory_space<vmem>>, vector<16x1xf32>
    %18 = vector.broadcast %17 : vector<16x1xf32> to vector<16x128xf32>
    %19 = arith.addf %16, %18 : vector<16x128xf32>
    %cst_17 = arith.constant 0.000000e+00 : f32
    %20 = vector.broadcast %cst_17 : f32 to vector<16x128xf32>
    %21 = arith.maximumf %19, %20 : vector<16x128xf32>
    %c0_18 = arith.constant 0 : index
    %c0_19 = arith.constant 0 : index
    %22 = vector.load %arg8[%c0_18, %c0_19] : memref<32x16xf32, #tpu.memory_space<vmem>>, vector<32x16xf32>
    %cst_20 = arith.constant dense<0.000000e+00> : vector<32x128xf32>
    %23 = tpu.matmul %22, %21, %cst_20 {dimension_numbers = #tpu.dot_dimension_numbers<[1], [0], [0], [1], [0, 0, 1, 1], [], []>} : vector<32x16xf32>, vector<16x128xf32>, vector<32x128xf32> -> vector<32x128xf32>
    %c0_21 = arith.constant 0 : index
    %c0_22 = arith.constant 0 : index
    %24 = vector.load %arg9[%c0_21, %c0_22] : memref<32x1xf32, #tpu.memory_space<vmem>>, vector<32x1xf32>
    %25 = vector.broadcast %24 : vector<32x1xf32> to vector<32x128xf32>
    %26 = arith.addf %23, %25 : vector<32x128xf32>
    %27 = arith.negf %26 : vector<32x128xf32>
    %28 = math.exp %27 : vector<32x128xf32>
    %cst_23 = arith.constant 1.000000e+00 : f32
    %29 = vector.broadcast %cst_23 : f32 to vector<32x128xf32>
    %30 = arith.addf %29, %28 : vector<32x128xf32>
    %31 = arith.divf %29, %30 : vector<32x128xf32>
    %c0_24 = arith.constant 0 : index
    %c0_25 = arith.constant 0 : index
    %32 = vector.load %arg10[%c0_24, %c0_25] : memref<32x128xf32, #tpu.memory_space<vmem>>, vector<32x128xf32>
    tpu.vector_store %arg10[%c0_24, %c0_25], %31 {strides = array<i32>} : memref<32x128xf32, #tpu.memory_space<vmem>>, vector<32x128xf32>,
    %c0_26 = arith.constant 0 : index
    %c0_27 = arith.constant 0 : index
    %33 = vector.load %arg11[%c0_26, %c0_27] : memref<8x128xf32, #tpu.memory_space<vmem>>, vector<8x128xf32>
    tpu.vector_store %arg11[%c0_26, %c0_27], %14 {strides = array<i32>} : memref<8x128xf32, #tpu.memory_space<vmem>>, vector<8x128xf32>,
    return
  }
  func.func @transform_0(%arg0: i32) -> (i32, i32) {
    %c0_i32 = arith.constant 0 : i32
    %c0_i32_0 = arith.constant 0 : i32
    return %c0_i32, %arg0 : i32, i32
  }
  func.func @transform_1(%arg0: i32) -> (i32, i32) {
    %c0_i32 = arith.constant 0 : i32
    %c0_i32_0 = arith.constant 0 : i32
    %c0_i32_1 = arith.constant 0 : i32
    return %c0_i32, %c0_i32_0 : i32, i32
  }
  func.func @transform_2(%arg0: i32) -> (i32, i32) {
    %c0_i32 = arith.constant 0 : i32
    %c0_i32_0 = arith.constant 0 : i32
    %c0_i32_1 = arith.constant 0 : i32
    return %c0_i32, %c0_i32_0 : i32, i32
  }
  func.func @transform_3(%arg0: i32) -> (i32, i32) {
    %c0_i32 = arith.constant 0 : i32
    %c0_i32_0 = arith.constant 0 : i32
    %c0_i32_1 = arith.constant 0 : i32
    return %c0_i32, %c0_i32_0 : i32, i32
  }
  func.func @transform_4(%arg0: i32) -> (i32, i32) {
    %c0_i32 = arith.constant 0 : i32
    %c0_i32_0 = arith.constant 0 : i32
    %c0_i32_1 = arith.constant 0 : i32
    return %c0_i32, %c0_i32_0 : i32, i32
  }
  func.func @transform_5(%arg0: i32) -> (i32, i32) {
    %c0_i32 = arith.constant 0 : i32
    %c0_i32_0 = arith.constant 0 : i32
    %c0_i32_1 = arith.constant 0 : i32
    return %c0_i32, %c0_i32_0 : i32, i32
  }
  func.func @transform_6(%arg0: i32) -> (i32, i32) {
    %c0_i32 = arith.constant 0 : i32
    %c0_i32_0 = arith.constant 0 : i32
    %c0_i32_1 = arith.constant 0 : i32
    return %c0_i32, %c0_i32_0 : i32, i32
  }
  func.func @transform_7(%arg0: i32) -> (i32, i32) {
    %c0_i32 = arith.constant 0 : i32
    %c0_i32_0 = arith.constant 0 : i32
    %c0_i32_1 = arith.constant 0 : i32
    return %c0_i32, %c0_i32_0 : i32, i32
  }
  func.func @transform_8(%arg0: i32) -> (i32, i32) {
    %c0_i32 = arith.constant 0 : i32
    %c0_i32_0 = arith.constant 0 : i32
    %c0_i32_1 = arith.constant 0 : i32
    return %c0_i32, %c0_i32_0 : i32, i32
  }
  func.func @transform_9(%arg0: i32) -> (i32, i32) {
    %c0_i32 = arith.constant 0 : i32
    %c0_i32_0 = arith.constant 0 : i32
    return %c0_i32, %arg0 : i32, i32
  }
  func.func @transform_10(%arg0: i32) -> (i32, i32) {
    %c0_i32 = arith.constant 0 : i32
    %c0_i32_0 = arith.constant 0 : i32
    return %c0_i32, %arg0 : i32, i32
  }
}

</mosaic_0001>

<bundles_post_ra>
// kernel: autoencoder_forward.1
= control target key start
LH: loop header
LB: loop body
LE: loop exit
PB: predicated region body
PF: predicated region fallthrough
CT: control target
= control target key end

     0   :  { %vm52_vm0 = vcmask 261120   ;;  %v581_v3 = vmov 0   ;;  %v582_v14 = vmov 0.0|0.0   ;;  %vm583_vm1 = vmmov 0   ;;  %s728_s0 = inlined_call_operand.vmem [shape: f32[32,128], index: 0, kind: input, shape index: {}]   ;;  %s729_s1 = inlined_call_operand.vmem [shape: f32[16,32], index: 1, kind: input, shape index: {}]   ;;  %s730_s2 = inlined_call_operand.vmem [shape: f32[16,1], index: 2, kind: input, shape index: {}]   ;;  %s731_s6 = inlined_call_operand.vmem [shape: f32[16,1], index: 6, kind: input, shape index: {}]   ;;  %s732_s8 = inlined_call_operand.vmem [shape: f32[32,1], index: 8, kind: input, shape index: {}]   ;;  %s733_s4 = inlined_call_operand.vmem [shape: f32[8,1], index: 4, kind: input, shape index: {}]   ;;  %s734_s3 = inlined_call_operand.vmem [shape: f32[8,16], index: 3, kind: input, shape index: {}]   ;;  %s735_s5 = inlined_call_operand.vmem [shape: f32[16,8], index: 5, kind: input, shape index: {}]   ;;  %s736_s10 = inlined_call_operand.vmem [shape: f32[8,128], index: 10, kind: output, shape index: {1}]   ;;  %s737_s7 = inlined_call_operand.vmem [shape: f32[32,16], index: 7, kind: input, shape index: {}]   ;;  %s738_s9 = inlined_call_operand.vmem [shape: f32[32,128], index: 9, kind: output, shape index: {0}]  }
   0x1   :  { %v34_v0 = vld [vmem:[%s728_s0] sm:$0xff]  ;;  %v35_v1 = vld [vmem:[%s728_s0 + $0x8] sm:$0xff]  ;;  %v36_v2 = vld [vmem:[%s728_s0 + $0x10] sm:$0xff]  ;;  %563 = vset.pattern.permute.xlu0 %v581_v3  ;;  %564 = vset.pattern.permute.xlu1 %v581_v3  ;;  %v584_v15 = vmov 0.0   ;;  %vm143_vm2 = vcmask 130048   ;;  %vm232_vm3 = vcmask 64512  }
   0x2   :  { %v542_v4 = vpack.c.bf16 %v35_v1, %v34_v0  ;;  %v37_v5 = vld [vmem:[%s728_s0 + $0x18] sm:$0xff]  ;;  %v38_v6 = vld [vmem:[%s729_s1] sm:$0xff]  ;;  %v41_v9 = vld [vmem:[%s730_s2 + $0x8] sm:$0xff]  ;;  %550 = vmatprep.subr.bf16.mxu1 %v582_v14  ;;  %524 = vmatprep.mubr.msk.f32.mxu1 %vm583_vm1, %v584_v15 }
   0x3   :  { %v546_v7 = vpack.c.bf16 %v37_v5, %v36_v2  ;;  %517 = vmatprep.mubr.msk.f32.mxu0 %vm52_vm0, %v38_v6  ;;  %v40_v8 = vld [vmem:[%s730_s2] sm:$0xff]  ;;  %v39_v10 = vld [vmem:[%s729_s1 + $0x8] sm:$0xff]  ;;  %v323_v13 = vld [vmem:[%s732_s8 + $0x18] sm:$0xff] }
   0x4   :  { %543 = vmatprep.subr.bf16.mxu0 %v542_v4  ;;  %44 = vperm.xlu0 %563, %v40_v8   ;;  %v221_v11 = vld [vmem:[%s731_s6 + $0x8] sm:$0xff]  ;;  %v137_v16 = vld [vmem:[%s733_s4] sm:$0xff]  ;;  %v322_v19 = vld [vmem:[%s732_s8 + $0x10] sm:$0xff] }
   0x5   :  { %545 = vmatpush3.bf16.msra.mxu0 %v542_v4  ;;  %v321_v12 = vld [vmem:[%s732_s8 + $0x8] sm:$0xff]  ;;  %140 = vperm.xlu1 %564, %v137_v16   ;;  %v220_v17 = vld [vmem:[%s731_s6] sm:$0xff]  ;;  %v318_v38 = vld [vmem:[%s737_s7 + $0x10] sm:$0xff] }
   0x6   :  { %547 = vmatprep.subr.bf16.mxu0 %v546_v7  ;;  %v320_v18 = vld [vmem:[%s732_s8] sm:$0xff]  ;;  %v219_v36 = vld [vmem:[%s735_s5 + $0x8] sm:$0xff]  ;;  %v319_v49 = vld [vmem:[%s737_s7 + $0x18] sm:$0xff] }
   0x7   :  { %v136_v29 = vld [vmem:[%s734_s3] sm:$0xff]  ;;  %v317_v48 = vld [vmem:[%s737_s7 + $0x8] sm:$0xff] }
   0x8   :  { %49 = vperm.xlu0 %563, %v41_v9   ;;  %v218_v30 = vld [vmem:[%s735_s5] sm:$0xff] }
   0x9   :  { %549 = vmatpush3.bf16.msra.mxu0 %v546_v7  ;;  %224 = vperm.xlu1 %564, %v220_v17   ;;  %v316_v37 = vld [vmem:[%s737_s7] sm:$0xff] }
   0xc   :  { %518 = vmatmul.mubr.msk.f32.vlgmr.msra.gmra.mrb[0].mxu0 %vm52_vm0, %v39_v10  ;;  %229 = vperm.xlu0 %563, %v221_v11  }
   0xd   :  { %326 = vperm.xlu1 %564, %v320_v18   ;;  %536 = vmatprep.mubr.msk.f32.mxu0 %vm143_vm2, %v316_v37 }
  0x10   :  { %331 = vperm.xlu0 %563, %v321_v12  }
  0x11   :  { %336 = vperm.xlu1 %564, %v322_v19  }
  0x14   :  { %341 = vperm.xlu0 %563, %v323_v13  }
  0x83   :  { %v45_v20 = vpop.permute.xlu0 %44 }
  0x84   :  { %v141_v31 = vpop.permute.xlu1 %140 }
  0x87   :  { %v50_v21 = vpop.permute.xlu0 %49 }
  0x88   :  { %v225_v41 = vpop.permute.xlu1 %224 }
  0x8b   :  { %v230_v39 = vpop.permute.xlu0 %229 }
  0x8c   :  { %v327_v51 = vpop.permute.xlu1 %326 }
  0x8f   :  { %v332_v50 = vpop.permute.xlu0 %331 }
  0x90   :  { %v337_v53 = vpop.permute.xlu1 %336 }
  0x93   :  { %v342_v52 = vpop.permute.xlu0 %341 }
  0xdf   :  { %v519_v22 = vpop.f32.mrb[0].mxu0 }
  0xe0   :  { %v131_v23 = vadd.f32 %v519_v22, %v50_v21  ;;  %v125_v24 = vpop.f32.mrb[1].mxu0 }
  0xe1   :  { %v126_v25 = vadd.f32 %v125_v24, %v45_v20 }
  0xe2   :  { %v135_v26 = vmax.f32 %v131_v23, 0.0 }
  0xe3   :  { %v134_v27 = vmax.f32 %v126_v25, 0.0 }
  0xe5   :  { %v551_v28 = vpack.c.bf16 %v135_v26, %v134_v27 }
  0xe7   :  { %552 = vmatpush3.bf16.msra.mxu1 %v551_v28 }
  0xea   :  { %525 = vmatmul.mubr.msk.f32.vlgmr.msra.gmra.mrb[0].mxu1 %vm143_vm2, %v136_v29 }
  0xeb   :  { %529 = vmatprep.mubr.msk.f32.mxu1 %vm232_vm3, %v218_v30 }
 0x1bd   :  { %v213_v32 = vpop.f32.mrb[0].mxu1 }
 0x1be   :  { %v214_v33 = vadd.f32 %v213_v32, %v141_v31  ;;  %v526_v34 = vpop.f32.mrb[1].mxu1 }
 0x1c0   :  { %v217_v35 = vmax.f32 %v214_v33, 0.0 }
 0x1c2   :  { %469 = vst [vmem:[%s736_s10] sm:$0xff] %v217_v35  ;;  %527 = vmatprep.subr.mxu1 %v217_v35 }
 0x1c3   :  { %528 = vmatpush3.msra.mxu1 %v217_v35 }
 0x1c4   :  { %530 = vmatmul.mubr.msk.f32.vlgmr.msra.gmra.mrb[2].mxu1 %vm232_vm3, %v219_v36 }
 0x1c5   :  { %539 = vmatprep.mubr.msk.f32.mxu1 %vm143_vm2, %v318_v38 }
 0x297   :  { %v531_v40 = vpop.f32.mrb[2].mxu1 }
 0x298   :  { %v311_v42 = vadd.f32 %v531_v40, %v230_v39  ;;  %v305_v43 = vpop.f32.mrb[3].mxu1 }
 0x299   :  { %v306_v44 = vadd.f32 %v305_v43, %v225_v41 }
 0x29a   :  { %v315_v45 = vmax.f32 %v311_v42, 0.0 }
 0x29b   :  { %v314_v46 = vmax.f32 %v306_v44, 0.0 }
 0x29d   :  { %v553_v47 = vpack.c.bf16 %v315_v45, %v314_v46 }
 0x29f   :  { %554 = vmatprep.subr.bf16.mxu0 %v553_v47  ;;  %557 = vmatprep.subr.bf16.mxu1 %v553_v47 }
 0x2a0   :  { %556 = vmatpush3.bf16.msra.mxu0 %v553_v47  ;;  %558 = vmatpush3.bf16.msra.mxu1 %v553_v47 }
 0x2a3   :  { %537 = vmatmul.mubr.msk.f32.vlgmr.msra.gmra.mrb[2].mxu0 %vm143_vm2, %v317_v48  ;;  %540 = vmatmul.mubr.msk.f32.vlgmr.msra.gmra.mrb[4].mxu1 %vm143_vm2, %v319_v49 }
 0x376   :  { %v538_v54 = vpop.f32.mrb[2].mxu0  ;;  %v541_v55 = vpop.f32.mrb[4].mxu1 }
 0x377   :  { %v428_v56 = vadd.f32 %v538_v54, %v332_v50  ;;  %v438_v57 = vadd.f32 %v541_v55, %v342_v52  ;;  %v422_v58 = vpop.f32.mrb[3].mxu0  ;;  %v432_v59 = vpop.f32.mrb[5].mxu1 }
 0x378   :  { %v423_v60 = vadd.f32 %v422_v58, %v327_v51  ;;  %v433_v61 = vadd.f32 %v432_v59, %v337_v53 }
 0x379   :  { %v488_v62 = vmul.f32 -1.442695, %v428_v56  ;;  %v490_v63 = vmul.f32 -1.442695, %v438_v57 }
 0x37a   :  { %v487_v0 = vmul.f32 -1.442695, %v423_v60  ;;  %v489_v1 = vmul.f32 -1.442695, %v433_v61 }
 0x37b   :  { %565 = vpow2.f32 %v488_v62 }
 0x37c   :  { %567 = vpow2.f32 %v490_v63 }
 0x37d   :  { %569 = vpow2.f32 %v487_v0 }
 0x37e   :  { %571 = vpow2.f32 %v489_v1 }
 0x385   :  { %v566_v2 = vpop.eup %565 }
 0x386   :  { %v568_v3 = vpop.eup %567  ;;  %v454_v4 = vadd.f32 1.0, %v566_v2 }
 0x387   :  { %v570_v5 = vpop.eup %569  ;;  %v456_v6 = vadd.f32 1.0, %v568_v3 }
 0x388   :  { %v572_v7 = vpop.eup %571  ;;  %573 = vrcp.f32 %v454_v4  ;;  %v453_v8 = vadd.f32 1.0, %v570_v5 }
 0x389   :  { %575 = vrcp.f32 %v456_v6  ;;  %v455_v9 = vadd.f32 1.0, %v572_v7 }
 0x38a   :  { %577 = vrcp.f32 %v453_v8 }
 0x38b   :  { %579 = vrcp.f32 %v455_v9 }
 0x392   :  { %v574_v10 = vpop.eup %573 }
 0x393   :  { %v576_v11 = vpop.eup %575  ;;  %466 = vst [vmem:[%s738_s9 + $0x8] sm:$0xff] %v574_v10 }
 0x394   :  { %v578_v12 = vpop.eup %577  ;;  %468 = vst [vmem:[%s738_s9 + $0x18] sm:$0xff] %v576_v11 }
 0x395   :  { %v580_v13 = vpop.eup %579  ;;  %465 = vst [vmem:[%s738_s9] sm:$0xff] %v578_v12 }
 0x396   :  { %467 = vst [vmem:[%s738_s9 + $0x10] sm:$0xff] %v580_v13 }

</bundles_post_ra>
